<compile_context>
chip_gen: v5e
topology: v5e:2x2
jax: 0.10.0
libtpu: 0.0.40
codegen_flags: <defaults>
</compile_context>

<pallas_src>
import jax
import jax.numpy as jnp
from jax.experimental import pallas as pl
from jax.experimental.pallas import tpu as pltpu


def _round_up(x, m):
    return ((x + m - 1) // m) * m


def _mlm_head_kernel(x_ref, w_ref, b_ref, o_ref):
    # x_ref: (tm, H) activations | w_ref: (H, tn) weight cols | b_ref: (1, tn)
    acc = jnp.dot(x_ref[...], w_ref[...], preferred_element_type=jnp.float32)
    o_ref[...] = (acc + b_ref[...].astype(jnp.float32)).astype(o_ref.dtype)


class MLMHeadPallas:
    """Tied MLM head: logits = dropout(features) @ W^T + b."""

    def __init__(self, weight, bias, *, dropout_rate=0.0,
                 tile_m=1024, tile_n=512,
                 compute_dtype=jnp.bfloat16, out_dtype=None):
        V, H = weight.shape
        assert bias.shape == (V,)
        assert tile_m % 8 == 0 and tile_n % 128 == 0
        self.V, self.H = V, H
        self.dropout_rate = float(dropout_rate)
        self.compute_dtype = compute_dtype
        self.out_dtype = out_dtype
        self.tile_m, self.tile_n = tile_m, tile_n
        # One-time prep hoisted out of the per-call hot path: cast + transpose
        # the tied embedding so the MXU sees a plain (M,K)x(K,N) matmul.
        w = weight if compute_dtype is None else weight.astype(compute_dtype)
        self.w_t = jnp.transpose(w)                       # (H, V), materialized once
        self.bias2d = bias.reshape(1, V).astype(jnp.float32)

    def __call__(self, features, *, training=False):
        if training and self.dropout_rate > 0.0:
            # TODO(synk): training-mode dropout mask via pltpu.prng_* not wired.
            raise NotImplementedError("training-mode dropout (p>0) not implemented")

        B, S, H = features.shape
        assert H == self.H
        V, M = self.V, B * S

        # TODO(synk): for MLM training, scalar-prefetch the masked-position
        # indices and gather only those rows so M shrinks ~6.7x before matmul.

        x = features.reshape(M, H)
        if self.compute_dtype is not None:
            x = x.astype(self.compute_dtype)
        out_dtype = self.out_dtype if self.out_dtype is not None else features.dtype

        in_itemsize = jnp.dtype(x.dtype).itemsize
        out_itemsize = jnp.dtype(out_dtype).itemsize

        # Tile sizing: big M tiles (weight stream scales with ceil(M/tm)),
        # lane-dense vocab tiles; clipped to the problem, MXU-aligned.
        tm = min(self.tile_m, _round_up(M, 256))
        tn = min(self.tile_n, _round_up(V, 128))

        # Generation-aware VMEM budget with headroom for Mosaic scratch.
        try:
            vmem_cap = pltpu.get_tpu_info().vmem_capacity_bytes
        except Exception:  # interpreter / older runtime: assume smallest part (v7x)
            vmem_cap = 64 * 1024 * 1024
        vmem_budget = max(32 * 1024 * 1024, int(vmem_cap * 0.85))

        def vmem_need(tm_, tn_):
            return (2 * tm_ * H * in_itemsize        # x tiles (double buffered)
                    + 2 * H * tn_ * in_itemsize      # weight tiles
                    + 2 * 8 * tn_ * 4                # bias tile, sublane-padded to 8
                    + 2 * tm_ * tn_ * out_itemsize)  # output tiles

        while vmem_need(tm, tn) > vmem_budget and tm > 256:
            tm //= 2
        while vmem_need(tm, tn) > vmem_budget and tn > 128:
            tn //= 2
        vmem_limit = int(min(vmem_budget,
                             max(2 * vmem_need(tm, tn), 32 * 1024 * 1024)))

        grid = (pl.cdiv(M, tm), pl.cdiv(V, tn))

        cost = pl.CostEstimate(
            flops=2 * M * H * V,
            transcendentals=0,
            bytes_accessed=(M * H * in_itemsize
                            + grid[0] * V * H * in_itemsize   # weight re-stream per M tile
                            + V * 4
                            + M * V * out_itemsize),
        )

        out = pl.pallas_call(
            _mlm_head_kernel,
            out_shape=jax.ShapeDtypeStruct((M, V), out_dtype),
            grid_spec=pltpu.PrefetchScalarGridSpec(
                num_scalar_prefetch=0,
                grid=grid,
                in_specs=[
                    # Activation tile: VMEM-resident across the inner vocab axis.
                    pl.BlockSpec((tm, H), lambda i, j: (i, 0)),
                    # Weight columns (pre-transposed once at init, no XLU work).
                    # TODO(synk): sweep pipeline_mode=pl.Buffered(3) if DMA shows exposed.
                    pl.BlockSpec((H, tn), lambda i, j: (0, j)),
                    # Bias tile, blocked per vocab tile.
                    pl.BlockSpec((1, tn), lambda i, j: (0, j)),
                ],
                out_specs=pl.BlockSpec((tm, tn), lambda i, j: (i, j)),
            ),
            compiler_params=pltpu.CompilerParams(
                dimension_semantics=("parallel", "parallel"),
                vmem_limit_bytes=vmem_limit,
            ),
            cost_estimate=cost,
        )(x, self.w_t, self.bias2d)

        return out.reshape(B, S, V)


if __name__ == "__main__":
    # Small config exercising ragged blocks on both axes:
    # hidden=128, vocab=1000 (not a tile multiple), batch=2, seq=9 (M=18).
    B, S, H, V = 2, 9, 128, 1000

    key = jax.random.PRNGKey(0)
    k_feat, k_emb, k_bias = jax.random.split(key, 3)

    features = jax.random.normal(k_feat, (B, S, H), dtype=jnp.float32)
    emb_weight = jax.random.normal(k_emb, (V, H), dtype=jnp.float32) * 0.02
    bias = jax.random.normal(k_bias, (V,), dtype=jnp.float32) * 0.01

    x2 = features.reshape(B * S, H)

    # --- default bf16 streaming path (f32 accumulation) ---
    head_bf16 = MLMHeadPallas(emb_weight, bias)
    logits_bf = jax.block_until_ready(head_bf16(features))
    assert logits_bf.shape == (B, S, V)
    ref_bf = (jnp.dot(x2.astype(jnp.bfloat16),
                      emb_weight.astype(jnp.bfloat16).T,
                      preferred_element_type=jnp.float32) + bias).reshape(B, S, V)
    assert jnp.allclose(logits_bf.astype(jnp.float32), ref_bf, atol=5e-2, rtol=5e-2)

    # --- full f32 path ---
    head_f32 = MLMHeadPallas(emb_weight, bias, compute_dtype=None)
    logits = jax.block_until_ready(head_f32(features))
    assert logits.shape == (B, S, V)
    ref = (jnp.dot(x2, emb_weight.T,
                   preferred_element_type=jnp.float32) + bias).reshape(B, S, V)
    assert jnp.allclose(logits, ref, atol=2e-3, rtol=2e-3)

    print("KERNEL_OK")
</pallas_src>

<mosaic_0001>
module attributes {stable_mosaic.version = 11 : i64} {
  func.func @_mlm_head_kernel(%arg0: i32, %arg1: i32, %arg2: memref<256x128xbf16, #tpu.memory_space<vmem>>, %arg3: memref<128x512xbf16, #tpu.memory_space<vmem>>, %arg4: memref<1x512xf32, #tpu.memory_space<vmem>>, %arg5: memref<256x512xf32, #tpu.memory_space<vmem>>) attributes {dimension_semantics = [#tpu.dimension_semantics<parallel>, #tpu.dimension_semantics<parallel>], iteration_bounds = array<i64: 1, 2>, scalar_prefetch = 0 : i64, scratch_operands = 0 : i64, tpu.core_type = #tpu.core_type<tc>, window_params = [{transform_indices = @transform_0, window_bounds = array<i64: 256, 128>}, {transform_indices = @transform_1, window_bounds = array<i64: 128, 512>}, {transform_indices = @transform_2, window_bounds = array<i64: 1, 512>}, {transform_indices = @transform_3, window_bounds = array<i64: 256, 512>}]} {
    %c0 = arith.constant 0 : index
    %c0_0 = arith.constant 0 : index
    %0 = vector.load %arg2[%c0, %c0_0] : memref<256x128xbf16, #tpu.memory_space<vmem>>, vector<256x128xbf16>
    %c0_1 = arith.constant 0 : index
    %c0_2 = arith.constant 0 : index
    %1 = vector.load %arg3[%c0_1, %c0_2] : memref<128x512xbf16, #tpu.memory_space<vmem>>, vector<128x512xbf16>
    %cst = arith.constant dense<0.000000e+00> : vector<256x512xf32>
    %2 = tpu.matmul %0, %1, %cst {dimension_numbers = #tpu.dot_dimension_numbers<[1], [0], [0], [1], [0, 0, 1, 1], [], []>} : vector<256x128xbf16>, vector<128x512xbf16>, vector<256x512xf32> -> vector<256x512xf32>
    %c0_3 = arith.constant 0 : index
    %c0_4 = arith.constant 0 : index
    %3 = vector.load %arg4[%c0_3, %c0_4] : memref<1x512xf32, #tpu.memory_space<vmem>>, vector<1x512xf32>
    %4 = vector.broadcast %3 : vector<1x512xf32> to vector<256x512xf32>
    %5 = arith.addf %2, %4 : vector<256x512xf32>
    %c0_5 = arith.constant 0 : index
    %c0_6 = arith.constant 0 : index
    %6 = vector.load %arg5[%c0_5, %c0_6] : memref<256x512xf32, #tpu.memory_space<vmem>>, vector<256x512xf32>
    tpu.vector_store %arg5[%c0_5, %c0_6], %5 {strides = array<i32>} : memref<256x512xf32, #tpu.memory_space<vmem>>, vector<256x512xf32>,
    return
  }
  func.func @transform_0(%arg0: i32, %arg1: i32) -> (i32, i32) {
    %c0_i32 = arith.constant 0 : i32
    %c0_i32_0 = arith.constant 0 : i32
    return %arg0, %c0_i32 : i32, i32
  }
  func.func @transform_1(%arg0: i32, %arg1: i32) -> (i32, i32) {
    %c0_i32 = arith.constant 0 : i32
    %c0_i32_0 = arith.constant 0 : i32
    return %c0_i32, %arg1 : i32, i32
  }
  func.func @transform_2(%arg0: i32, %arg1: i32) -> (i32, i32) {
    %c0_i32 = arith.constant 0 : i32
    %c0_i32_0 = arith.constant 0 : i32
    return %c0_i32, %arg1 : i32, i32
  }
  func.func @transform_3(%arg0: i32, %arg1: i32) -> (i32, i32) {
    %c0_i32 = arith.constant 0 : i32
    return %arg0, %arg1 : i32, i32
  }
}

</mosaic_0001>

<bundles_post_ra>
// kernel: tpu_custom_call.1
= control target key start
LH: loop header
LB: loop body
LE: loop exit
PB: predicated region body
PF: predicated region fallthrough
CT: control target
= control target key end

     0   :  { %8 = vsyncpa [#allocation4], 0  ;;  %s2237_s0 = inlined_call_operand.vmem [shape: bf16[18,128], index: 0, kind: input, shape index: {}]   ;;  %s2238_s1 = inlined_call_operand.vmem [shape: bf16[128,1000], index: 1, kind: input, shape index: {}]   ;;  %s2239_s2 = inlined_call_operand.vmem [shape: f32[1,1000], index: 2, kind: input, shape index: {}]   ;;  %s2240_s3 = inlined_call_operand.hbm [shape: f32[18,1000], index: 3, kind: output, shape index: {}]  }
   0x1   :  { %10 = vsyncpa [#allocation4 + $0x1], 0  ;;  %s1679_s12 = smov 0   ;;  %s1681_s13 = smov 0  }
   0x2   :  { %s1683_s14 = smov 0   ;;  %s1685_s15 = smov 0  }
   0x3   :  { %s1687_s16 = smov 0   ;;  %s1689_s17 = smov 0  }
   0x4 LB: > { %s1264_s18 = sadd.s32 4294967295, %s1654_s17   ;;  %s1265_s19 = sadd.s32 4294967294, %s1654_s17   ;;  %s1654_s17 = sphi %s1689_s17, %s16_s17   ;;  %s1650_s16 = sphi %s1687_s16, %s2247_s16   ;;  %s1646_s15 = sphi %s1685_s15, %s2246_s15   ;;  %s1642_s14 = sphi %s1683_s14, %s2245_s14   ;;  %s1638_s13 = sphi %s1681_s13, %s2244_s13   ;;  %s1634_s12 = sphi %s1679_s12, %s2243_s12  }
   0x5   : > { %s25_s20 = sadd.s32 1, %s1650_s16  ;;  %s61_s21 = sadd.s32 1, %s1642_s14 }
   0x6   : > { %p26_p0 = scmp.ge.s32.totalorder %s25_s20, 2  ;;  %p68_p1 = scmp.ne.s32.totalorder %s1642_s14, %s1638_s13 }
   0x7   : > { %p69_p2 = scmp.eq.s32.totalorder %s1654_s17, 0  ;;  %p126_p3 = scmp.eq.s32.totalorder %s1264_s18, 1 }
   0x8   : > { %s2249_s20 = smov (%p26_p0, %s25_s20), 0  ;;  %p131_p6 = scmp.ne.s32.totalorder %s1638_s13, %s1634_s12 }
   0x9   : > { %p70_p4 = por %p69_p2, %p68_p1  ;;  %p1718_p5 = por %p126_p3, %p68_p1 }
   0xa   : > { %s58_s23 = ssub.s32 %s1650_s16, %s2249_s20  ;;  %p132_p8 = scmp.eq.s32.totalorder %s1265_s19, 1 }
   0xb   : > { %p59_p7 = scmp.eq.s32.totalorder %s58_s23, 0  ;;  %p1268_p10 = scmp.ge.s32.totalorder %s1654_s17, 2 }
   0xc   : > { %p1729_p9 = por %p132_p8, %p131_p6 }
   0xd   : > { %s1727_s24 = scalar_select %p59_p7, %s1642_s14, %s61_s21  }
   0xe   : > { %161 = sbr.rel (%p1268_p10) target bundleno = 55 (0x37), region = 20 }
  0x13   : > { %164 = sbr.rel (!%p70_p4) target bundleno = 55 (0x37), region = 24  ;;  %s166_s26 = sand.u32 (%p70_p4), 1, %s1642_s14  }
  0x14   : > { %s1473_s27 = sshll.u32 (%p70_p4), %s1650_s16, 4  ;;  %s1269_s28 = sshll.u32 (%p70_p4), %s166_s26, 8 }
  0x15   : > { %s1741_s4 = scalar_lea.vmem (%p70_p4), %s2238_s1, %s1473_s27  ;;  %s1746_s5 = scalar_lea.vmem (%p70_p4), [#allocation2], %s1269_s28 }
  0x16   : > { %v184_v0 = vld [vmem:[%s1741_s4] sm:$0xff] (%p70_p4)  ;;  %v186_v1 = vld [vmem:[%s1741_s4 + $0x8] sm:$0xff] (%p70_p4) }
  0x17   : > { %v188_v2 = vld [vmem:[%s1741_s4 + $0x20] sm:$0xff] (%p70_p4)  ;;  %185 = vst [vmem:[%s1746_s5] sm:$0xff] (%p70_p4), %v184_v0  ;;  %v190_v3 = vld [vmem:[%s1741_s4 + $0x28] sm:$0xff] (%p70_p4) }
  0x18   : > { %187 = vst [vmem:[%s1746_s5 + $0x8] sm:$0xff] %v186_v1  ;;  %v192_v4 = vld [vmem:[%s1741_s4 + $0x40] sm:$0xff]  ;;  %v194_v5 = vld [vmem:[%s1741_s4 + $0x48] sm:$0xff] }
  0x19   : > { %189 = vst [vmem:[%s1746_s5 + $0x10] sm:$0xff] %v188_v2  ;;  %v196_v6 = vld [vmem:[%s1741_s4 + $0x60] sm:$0xff]  ;;  %v198_v7 = vld [vmem:[%s1741_s4 + $0x68] sm:$0xff] }
  0x1a   : > { %191 = vst [vmem:[%s1746_s5 + $0x18] sm:$0xff] %v190_v3  ;;  %v200_v8 = vld [vmem:[%s1741_s4 + $0x80] sm:$0xff]  ;;  %v202_v9 = vld [vmem:[%s1741_s4 + $0x88] sm:$0xff] }
  0x1b   : > { %193 = vst [vmem:[%s1746_s5 + $0x20] sm:$0xff] %v192_v4  ;;  %v204_v10 = vld [vmem:[%s1741_s4 + $0xa0] sm:$0xff]  ;;  %v206_v11 = vld [vmem:[%s1741_s4 + $0xa8] sm:$0xff] }
  0x1c   : > { %195 = vst [vmem:[%s1746_s5 + $0x28] sm:$0xff] %v194_v5  ;;  %v208_v12 = vld [vmem:[%s1741_s4 + $0xc0] sm:$0xff]  ;;  %v210_v13 = vld [vmem:[%s1741_s4 + $0xc8] sm:$0xff] }
  0x1d   : > { %197 = vst [vmem:[%s1746_s5 + $0x30] sm:$0xff] %v196_v6  ;;  %v212_v14 = vld [vmem:[%s1741_s4 + $0xe0] sm:$0xff]  ;;  %v214_v15 = vld [vmem:[%s1741_s4 + $0xe8] sm:$0xff] }
  0x1e   : > { %199 = vst [vmem:[%s1746_s5 + $0x38] sm:$0xff] %v198_v7  ;;  %v216_v16 = vld [vmem:[%s1741_s4 + $0x100] sm:$0xff]  ;;  %v218_v17 = vld [vmem:[%s1741_s4 + $0x108] sm:$0xff] }
  0x1f   : > { %201 = vst [vmem:[%s1746_s5 + $0x40] sm:$0xff] %v200_v8  ;;  %v220_v18 = vld [vmem:[%s1741_s4 + $0x120] sm:$0xff]  ;;  %v222_v19 = vld [vmem:[%s1741_s4 + $0x128] sm:$0xff] }
  0x20   : > { %203 = vst [vmem:[%s1746_s5 + $0x48] sm:$0xff] %v202_v9  ;;  %v224_v20 = vld [vmem:[%s1741_s4 + $0x140] sm:$0xff]  ;;  %v226_v21 = vld [vmem:[%s1741_s4 + $0x148] sm:$0xff] }
  0x21   : > { %205 = vst [vmem:[%s1746_s5 + $0x50] sm:$0xff] %v204_v10  ;;  %v228_v22 = vld [vmem:[%s1741_s4 + $0x160] sm:$0xff]  ;;  %v230_v23 = vld [vmem:[%s1741_s4 + $0x168] sm:$0xff] }
  0x22   : > { %207 = vst [vmem:[%s1746_s5 + $0x58] sm:$0xff] %v206_v11  ;;  %v232_v24 = vld [vmem:[%s1741_s4 + $0x180] sm:$0xff]  ;;  %v234_v25 = vld [vmem:[%s1741_s4 + $0x188] sm:$0xff] }
  0x23   : > { %209 = vst [vmem:[%s1746_s5 + $0x60] sm:$0xff] %v208_v12  ;;  %v236_v26 = vld [vmem:[%s1741_s4 + $0x1a0] sm:$0xff]  ;;  %v238_v27 = vld [vmem:[%s1741_s4 + $0x1a8] sm:$0xff] }
  0x24   : > { %211 = vst [vmem:[%s1746_s5 + $0x68] sm:$0xff] %v210_v13  ;;  %v240_v28 = vld [vmem:[%s1741_s4 + $0x1c0] sm:$0xff]  ;;  %v242_v29 = vld [vmem:[%s1741_s4 + $0x1c8] sm:$0xff] }
  0x25   : > { %213 = vst [vmem:[%s1746_s5 + $0x70] sm:$0xff] %v212_v14  ;;  %v244_v30 = vld [vmem:[%s1741_s4 + $0x1e0] sm:$0xff]  ;;  %v246_v31 = vld [vmem:[%s1741_s4 + $0x1e8] sm:$0xff] }
  0x26   : > { %215 = vst [vmem:[%s1746_s5 + $0x78] sm:$0xff] %v214_v15 }
  0x27   : > { %217 = vst [vmem:[%s1746_s5 + $0x80] sm:$0xff] %v216_v16 }
  0x28   : > { %219 = vst [vmem:[%s1746_s5 + $0x88] sm:$0xff] %v218_v17 }
  0x29   : > { %221 = vst [vmem:[%s1746_s5 + $0x90] sm:$0xff] %v220_v18 }
  0x2a   : > { %223 = vst [vmem:[%s1746_s5 + $0x98] sm:$0xff] %v222_v19 }
  0x2b   : > { %225 = vst [vmem:[%s1746_s5 + $0xa0] sm:$0xff] %v224_v20 }
  0x2c   : > { %227 = vst [vmem:[%s1746_s5 + $0xa8] sm:$0xff] %v226_v21 }
  0x2d   : > { %229 = vst [vmem:[%s1746_s5 + $0xb0] sm:$0xff] %v228_v22 }
  0x2e   : > { %231 = vst [vmem:[%s1746_s5 + $0xb8] sm:$0xff] %v230_v23 }
  0x2f   : > { %233 = vst [vmem:[%s1746_s5 + $0xc0] sm:$0xff] %v232_v24 }
  0x30   : > { %235 = vst [vmem:[%s1746_s5 + $0xc8] sm:$0xff] %v234_v25 }
  0x31   : > { %237 = vst [vmem:[%s1746_s5 + $0xd0] sm:$0xff] %v236_v26 }
  0x32   : > { %239 = vst [vmem:[%s1746_s5 + $0xd8] sm:$0xff] %v238_v27 }
  0x33   : > { %241 = vst [vmem:[%s1746_s5 + $0xe0] sm:$0xff] %v240_v28 }
  0x34   : > { %243 = vst [vmem:[%s1746_s5 + $0xe8] sm:$0xff] %v242_v29 }
  0x35   : > { %245 = vst [vmem:[%s1746_s5 + $0xf0] sm:$0xff] %v244_v30 }
  0x36   : > { %247 = vst [vmem:[%s1746_s5 + $0xf8] sm:$0xff] %v246_v31 }
  0x37 PF: > { %p1272_p11 = scmp.ge.s32.totalorder %s1654_s17, 1  ;;  %p260_p12 = scmp.lt.s32.totalorder %s1654_s17, 3 }
  0x39   : > { %p261_p13 = pnand %p1272_p11, %p260_p12 }
  0x3a   : > { %s1812_s6 = sand.u32 (!%p261_p13), 1, %s1638_s13  }
  0x3b   : > { %264 = sbr.rel (%p261_p13) target bundleno = 498 (0x1f2), region = 51  ;;  %s1273_s7 = sshll.u32 (!%p261_p13), %s1812_s6, 8 }
  0x3c   : > { %s1815_s8 = scalar_lea.vmem (!%p261_p13), [#allocation2], %s1273_s7  ;;  %s1275_s7 = sshll.u32 (!%p261_p13), %s1646_s15, 2 }
  0x3d   : > { %p313_p0 = scmp.lt.s32.totalorder (!%p261_p13), %s1275_s7, 7  ;;  %s1274_s19 = sshll.u32 (!%p261_p13), %s1812_s6, 10 }
  0x3e   : > { %s1919_s26 = scalar_lea.vmem (!%p261_p13), [#allocation3], %s1274_s19  ;;  %s1137_s23 = scalar_lea.sflag (!%p261_p13), [#allocation4], %s1812_s6 }
  0x40   : > { %v1454_v32 = vld [vmem:[%s1815_s8 + $0xe0] sm:$0xf]  ;;  %v1520_v33 = vld [vmem:[%s1815_s8 + $0xec] sm:$0xf0]  ;;  %v1518_v34 = vld [vmem:[%s1815_s8 + $0xe4] sm:$0xf] }
  0x41   : > { %v1455_v35 = vor.u32 %v1520_v33, %v1454_v32  ;;  %v1456_v36 = vld [vmem:[%s1815_s8 + $0xf0] sm:$0xf0]  ;;  %v1462_v37 = vld [vmem:[%s1815_s8 + $0xe8] sm:$0xf]  ;;  %v1521_v38 = vld [vmem:[%s1815_s8 + $0xf4] sm:$0xf0] }
  0x42   : > { %v1459_v39 = vor.u32 %v1518_v34, %v1456_v36  ;;  %v1463_v40 = vor.u32 %v1521_v38, %v1462_v37  ;;  %v1519_v41 = vld [vmem:[%s1815_s8 + $0xec] sm:$0xf]  ;;  %v1464_v42 = vld [vmem:[%s1815_s8 + $0xf8] sm:$0xf0]  ;;  %v1438_v43 = vld [vmem:[%s1815_s8 + $0xc0] sm:$0xf] }
  0x43   : > { %652 = vmatpush.bf16.msra.mxu0 %v1455_v35  ;;  %v1467_v44 = vor.u32 %v1519_v41, %v1464_v42  ;;  %v1516_v45 = vld [vmem:[%s1815_s8 + $0xcc] sm:$0xf0]  ;;  %v1514_v46 = vld [vmem:[%s1815_s8 + $0xc4] sm:$0xf]  ;;  %v1440_v47 = vld [vmem:[%s1815_s8 + $0xd0] sm:$0xf0] }
  0x44   : > { %741 = vmatpush.bf16.msra.mxu1 %v1459_v39  ;;  %830 = vmatpush.bf16.msra.mxu2 %v1463_v40  ;;  %v1439_v48 = vor.u32 %v1516_v45, %v1438_v43  ;;  %v1443_v49 = vor.u32 %v1514_v46, %v1440_v47  ;;  %v1446_v50 = vld [vmem:[%s1815_s8 + $0xc8] sm:$0xf]  ;;  %v1517_v51 = vld [vmem:[%s1815_s8 + $0xd4] sm:$0xf0]  ;;  %v1515_v52 = vld [vmem:[%s1815_s8 + $0xcc] sm:$0xf] }
  0x45   : > { %919 = vmatpush.bf16.msra.mxu3 %v1467_v44  ;;  %v1447_v53 = vor.u32 %v1517_v51, %v1446_v50  ;;  %v1448_v54 = vld [vmem:[%s1815_s8 + $0xd8] sm:$0xf0]  ;;  %v1422_v55 = vld [vmem:[%s1815_s8 + $0xa0] sm:$0xf]  ;;  %v1512_v56 = vld [vmem:[%s1815_s8 + $0xac] sm:$0xf0] }
  0x46   : > { %v1451_v57 = vor.u32 %v1515_v52, %v1448_v54  ;;  %v1510_v58 = vld [vmem:[%s1815_s8 + $0xa4] sm:$0xf]  ;;  %v1424_v59 = vld [vmem:[%s1815_s8 + $0xb0] sm:$0xf0]  ;;  %v1430_v60 = vld [vmem:[%s1815_s8 + $0xa8] sm:$0xf]  ;;  %v1423_v61 = vor.u32 %v1512_v56, %v1422_v55 }
  0x47   : > { %653 = vmatpush.bf16.msra.mxu0 %v1439_v48  ;;  %v1513_v62 = vld [vmem:[%s1815_s8 + $0xb4] sm:$0xf0]  ;;  %v1511_v63 = vld [vmem:[%s1815_s8 + $0xac] sm:$0xf]  ;;  %v1432_v0 = vld [vmem:[%s1815_s8 + $0xb8] sm:$0xf0]  ;;  %v1427_v1 = vor.u32 %v1510_v58, %v1424_v59 }
  0x48   : > { %742 = vmatpush.bf16.msra.mxu1 %v1443_v49  ;;  %831 = vmatpush.bf16.msra.mxu2 %v1447_v53  ;;  %v1431_v2 = vor.u32 %v1513_v62, %v1430_v60  ;;  %v1406_v3 = vld [vmem:[%s1815_s8 + $0x80] sm:$0xf]  ;;  %v1508_v4 = vld [vmem:[%s1815_s8 + $0x8c] sm:$0xf0]  ;;  %v1506_v5 = vld [vmem:[%s1815_s8 + $0x84] sm:$0xf]  ;;  %v1435_v6 = vor.u32 %v1511_v63, %v1432_v0 }
  0x49   : > { %920 = vmatpush.bf16.msra.mxu3 %v1451_v57  ;;  %v1408_v7 = vld [vmem:[%s1815_s8 + $0x90] sm:$0xf0]  ;;  %v1414_v8 = vld [vmem:[%s1815_s8 + $0x88] sm:$0xf]  ;;  %v1509_v9 = vld [vmem:[%s1815_s8 + $0x94] sm:$0xf0]  ;;  %v1407_v12 = vor.u32 %v1508_v4, %v1406_v3 }
  0x4a   : > { %v1507_v10 = vld [vmem:[%s1815_s8 + $0x8c] sm:$0xf]  ;;  %v1416_v11 = vld [vmem:[%s1815_s8 + $0x98] sm:$0xf0]  ;;  %v1411_v13 = vor.u32 %v1506_v5, %v1408_v7  ;;  %v1415_v14 = vor.u32 %v1509_v9, %v1414_v8  ;;  %v1390_v15 = vld [vmem:[%s1815_s8 + $0x60] sm:$0xf] }
  0x4b   : > { %654 = vmatpush.bf16.msra.mxu0 %v1423_v61  ;;  %v1504_v16 = vld [vmem:[%s1815_s8 + $0x6c] sm:$0xf0]  ;;  %v1502_v17 = vld [vmem:[%s1815_s8 + $0x64] sm:$0xf]  ;;  %v1419_v18 = vor.u32 %v1507_v10, %v1416_v11  ;;  %v1392_v19 = vld [vmem:[%s1815_s8 + $0x70] sm:$0xf0] }
  0x4c   : > { %743 = vmatpush.bf16.msra.mxu1 %v1427_v1  ;;  %832 = vmatpush.bf16.msra.mxu2 %v1431_v2  ;;  %v1398_v20 = vld [vmem:[%s1815_s8 + $0x68] sm:$0xf]  ;;  %v1505_v21 = vld [vmem:[%s1815_s8 + $0x74] sm:$0xf0]  ;;  %v1503_v22 = vld [vmem:[%s1815_s8 + $0x6c] sm:$0xf]  ;;  %v1391_v24 = vor.u32 %v1504_v16, %v1390_v15  ;;  %v1395_v25 = vor.u32 %v1502_v17, %v1392_v19 }
  0x4d   : > { %921 = vmatpush.bf16.msra.mxu3 %v1435_v6  ;;  %v1400_v23 = vld [vmem:[%s1815_s8 + $0x78] sm:$0xf0]  ;;  %v1399_v26 = vor.u32 %v1505_v21, %v1398_v20  ;;  %v1374_v27 = vld [vmem:[%s1815_s8 + $0x40] sm:$0xf]  ;;  %v1500_v28 = vld [vmem:[%s1815_s8 + $0x4c] sm:$0xf0] }
  0x4e   : > { %v1498_v29 = vld [vmem:[%s1815_s8 + $0x44] sm:$0xf]  ;;  %v1403_v30 = vor.u32 %v1503_v22, %v1400_v23  ;;  %v1376_v31 = vld [vmem:[%s1815_s8 + $0x50] sm:$0xf0]  ;;  %v1382_v32 = vld [vmem:[%s1815_s8 + $0x48] sm:$0xf]  ;;  %v1375_v36 = vor.u32 %v1500_v28, %v1374_v27 }
  0x4f   : > { %655 = vmatpush.bf16.msra.mxu0 %v1407_v12  ;;  %v1501_v33 = vld [vmem:[%s1815_s8 + $0x54] sm:$0xf0]  ;;  %v1499_v34 = vld [vmem:[%s1815_s8 + $0x4c] sm:$0xf]  ;;  %v1384_v35 = vld [vmem:[%s1815_s8 + $0x58] sm:$0xf0]  ;;  %v1379_v37 = vor.u32 %v1498_v29, %v1376_v31 }
  0x50   : > { %744 = vmatpush.bf16.msra.mxu1 %v1411_v13  ;;  %833 = vmatpush.bf16.msra.mxu2 %v1415_v14  ;;  %v1383_v38 = vor.u32 %v1501_v33, %v1382_v32  ;;  %v1358_v39 = vld [vmem:[%s1815_s8 + $0x20] sm:$0xf]  ;;  %v1496_v40 = vld [vmem:[%s1815_s8 + $0x2c] sm:$0xf0]  ;;  %v1494_v41 = vld [vmem:[%s1815_s8 + $0x24] sm:$0xf]  ;;  %v1387_v42 = vor.u32 %v1499_v34, %v1384_v35 }
  0x51   : > { %922 = vmatpush.bf16.msra.mxu3 %v1419_v18  ;;  %v1360_v43 = vld [vmem:[%s1815_s8 + $0x30] sm:$0xf0]  ;;  %v1366_v44 = vld [vmem:[%s1815_s8 + $0x28] sm:$0xf]  ;;  %v1497_v45 = vld [vmem:[%s1815_s8 + $0x34] sm:$0xf0]  ;;  %v1359_v48 = vor.u32 %v1496_v40, %v1358_v39 }
  0x52   : > { %v1495_v46 = vld [vmem:[%s1815_s8 + $0x2c] sm:$0xf]  ;;  %v1368_v47 = vld [vmem:[%s1815_s8 + $0x38] sm:$0xf0]  ;;  %v1363_v49 = vor.u32 %v1494_v41, %v1360_v43  ;;  %v1367_v50 = vor.u32 %v1497_v45, %v1366_v44  ;;  %v1342_v51 = vld [vmem:[%s1815_s8] sm:$0xf] }
  0x53   : > { %656 = vmatpush.bf16.msra.mxu0 %v1391_v24  ;;  %v1492_v52 = vld [vmem:[%s1815_s8 + $0xc] sm:$0xf0]  ;;  %v1490_v53 = vld [vmem:[%s1815_s8 + $0x4] sm:$0xf]  ;;  %v1371_v54 = vor.u32 %v1495_v46, %v1368_v47  ;;  %v1344_v55 = vld [vmem:[%s1815_s8 + $0x10] sm:$0xf0] }
  0x54   : > { %745 = vmatpush.bf16.msra.mxu1 %v1395_v25  ;;  %834 = vmatpush.bf16.msra.mxu2 %v1399_v26  ;;  %v1350_v56 = vld [vmem:[%s1815_s8 + $0x8] sm:$0xf]  ;;  %v1493_v57 = vld [vmem:[%s1815_s8 + $0x14] sm:$0xf0]  ;;  %v1491_v58 = vld [vmem:[%s1815_s8 + $0xc] sm:$0xf]  ;;  %v1343_v60 = vor.u32 %v1492_v52, %v1342_v51  ;;  %v1347_v61 = vor.u32 %v1490_v53, %v1344_v55 }
  0x55   : > { %923 = vmatpush.bf16.msra.mxu3 %v1403_v30  ;;  %v1352_v59 = vld [vmem:[%s1815_s8 + $0x18] sm:$0xf0]  ;;  %v1351_v62 = vor.u32 %v1493_v57, %v1350_v56  ;;  %v1474_v0 = vld [vmem:[%s2237_s0] sm:$0xff]  ;;  %v1475_v1 = vld [vmem:[%s2237_s0 + $0x8] sm:$0xff]  ;;  %s2251_s7 = smov (!%p313_p0, %s1275_s7), 7 }
  0x56   : > { %v1355_v63 = vor.u32 %v1491_v58, %v1352_v59  ;;  %v1476_v2 = vld [vmem:[%s2237_s0 + $0x10] sm:$0xff]  ;;  %v1477_v3 = vld [vmem:[%s2237_s0 + $0x18] sm:$0xff]  ;;  %v1478_v4 = vld [vmem:[%s2237_s0 + $0x20] sm:$0xff]  ;;  %s315_s18 = scalar_lea.vmem %s2239_s2, %s2251_s7 }
  0x57   : > { %657 = vmatpush.bf16.msra.mxu0 %v1375_v36  ;;  %v1479_v5 = vld [vmem:[%s2237_s0 + $0x28] sm:$0xff]  ;;  %v1480_v6 = vld [vmem:[%s2237_s0 + $0x30] sm:$0xff]  ;;  %v1481_v7 = vld [vmem:[%s2237_s0 + $0x38] sm:$0xff] }
  0x58   : > { %746 = vmatpush.bf16.msra.mxu1 %v1379_v37  ;;  %835 = vmatpush.bf16.msra.mxu2 %v1383_v38  ;;  %v386_v8 = vld [vmem:[%s315_s18] sm:$0xf]  ;;  %v1483_v27 = vld [vmem:[%s2237_s0 + $0x48] sm:$0xff]  ;;  %v1484_v44 = vld [vmem:[%s2237_s0 + $0x50] sm:$0xff] }
  0x59   : > { %924 = vmatpush.bf16.msra.mxu3 %v1387_v42  ;;  %v1910_v9 = vperm.slane %v386_v8, 0  ;;  %v1912_v10 = vperm.slane %v386_v8, 1  ;;  %v1482_v11 = vld [vmem:[%s2237_s0 + $0x40] sm:$0xff]  ;;  %v1923_v16 = vperm.slane %v386_v8, 2  ;;  %v1925_v17 = vperm.slane %v386_v8, 3 }
  0x5b   : > { %658 = vmatpush.bf16.msra.mxu0 %v1359_v48 }
  0x5c   : > { %747 = vmatpush.bf16.msra.mxu1 %v1363_v49  ;;  %836 = vmatpush.bf16.msra.mxu2 %v1367_v50 }
  0x5d   : > { %925 = vmatpush.bf16.msra.mxu3 %v1371_v54 }
  0x5f   : > { %659 = vmatpush.bf16.msra.mxu0 %v1343_v60 }
  0x60   : > { %748 = vmatpush.bf16.msra.mxu1 %v1347_v61  ;;  %837 = vmatpush.bf16.msra.mxu2 %v1351_v62  ;;  %v1485_v61 = vld [vmem:[%s2237_s0 + $0x58] sm:$0xff] }
  0x61   : > { %926 = vmatpush.bf16.msra.mxu3 %v1355_v63 }
  0x62   : > { %660 = vmatmul.bf16.vlgmr.msra.gmra.mxu0 %v1474_v0 }
  0x63   : > { %749 = vmatmul.bf16.vlgmr.msra.gmra.mxu1 %v1474_v0  ;;  %838 = vmatmul.bf16.vlgmr.msra.gmra.mxu2 %v1474_v0 }
  0x64   : > { %927 = vmatmul.bf16.vlgmr.msra.gmra.mxu3 %v1474_v0 }
  0x72   : > { %665 = vmatmul.bf16.gmra.mxu0 %v1475_v1 }
  0x73   : > { %754 = vmatmul.bf16.gmra.mxu1 %v1475_v1  ;;  %843 = vmatmul.bf16.gmra.mxu2 %v1475_v1 }
  0x74   : > { %932 = vmatmul.bf16.gmra.mxu3 %v1475_v1 }
  0x82   : > { %670 = vmatmul.bf16.gmra.mxu0 %v1476_v2 }
  0x83   : > { %759 = vmatmul.bf16.gmra.mxu1 %v1476_v2  ;;  %848 = vmatmul.bf16.gmra.mxu2 %v1476_v2 }
  0x84   : > { %937 = vmatmul.bf16.gmra.mxu3 %v1476_v2 }
  0x92   : > { %675 = vmatmul.bf16.gmra.mxu0 %v1477_v3 }
  0x93   : > { %764 = vmatmul.bf16.gmra.mxu1 %v1477_v3  ;;  %853 = vmatmul.bf16.gmra.mxu2 %v1477_v3 }
  0x94   : > { %942 = vmatmul.bf16.gmra.mxu3 %v1477_v3 }
  0xa2   : > { %680 = vmatmul.bf16.gmra.mxu0 %v1478_v4 }
  0xa3   : > { %769 = vmatmul.bf16.gmra.mxu1 %v1478_v4  ;;  %858 = vmatmul.bf16.gmra.mxu2 %v1478_v4 }
  0xa4   : > { %947 = vmatmul.bf16.gmra.mxu3 %v1478_v4 }
  0xb2   : > { %685 = vmatmul.bf16.gmra.mxu0 %v1479_v5 }
  0xb3   : > { %774 = vmatmul.bf16.gmra.mxu1 %v1479_v5  ;;  %863 = vmatmul.bf16.gmra.mxu2 %v1479_v5 }
  0xb4   : > { %952 = vmatmul.bf16.gmra.mxu3 %v1479_v5 }
  0xc2   : > { %690 = vmatmul.bf16.gmra.mxu0 %v1480_v6 }
  0xc3   : > { %779 = vmatmul.bf16.gmra.mxu1 %v1480_v6  ;;  %868 = vmatmul.bf16.gmra.mxu2 %v1480_v6 }
  0xc4   : > { %957 = vmatmul.bf16.gmra.mxu3 %v1480_v6 }
  0xd2   : > { %695 = vmatmul.bf16.gmra.mxu0 %v1481_v7 }
  0xd3   : > { %784 = vmatmul.bf16.gmra.mxu1 %v1481_v7  ;;  %873 = vmatmul.bf16.gmra.mxu2 %v1481_v7 }
  0xd4   : > { %962 = vmatmul.bf16.gmra.mxu3 %v1481_v7 }
  0xdf   : > { %v661_v12 = vpop.f32.mrf.mxu0 }
  0xe0   : > { %v662_v13 = vadd.f32 %v661_v12, %v1910_v9  ;;  %v750_v14 = vpop.f32.mrf.mxu1 }
  0xe1   : > { %v751_v15 = vadd.f32 %v750_v14, %v1912_v10 }
  0xe2   : > { %1008 = vst [vmem:[%s1919_s26] sm:$0xff] %v662_v13  ;;  %700 = vmatmul.bf16.gmra.mxu0 %v1482_v11 }
  0xe3   : > { %1009 = vst [vmem:[%s1919_s26 + $0x8] sm:$0xff] %v751_v15  ;;  %789 = vmatmul.bf16.gmra.mxu1 %v1482_v11  ;;  %878 = vmatmul.bf16.gmra.mxu2 %v1482_v11 }
  0xe4   : > { %967 = vmatmul.bf16.gmra.mxu3 %v1482_v11 }
  0xe6   : > { %v839_v18 = vpop.f32.mrf.mxu2 }
  0xe7   : > { %v840_v19 = vadd.f32 %v839_v18, %v1923_v16  ;;  %v928_v20 = vpop.f32.mrf.mxu3  ;;  %v663_v21 = vpop.f32.mrf.mxu0  ;;  %v1486_v18 = vld [vmem:[%s2237_s0 + $0x60] sm:$0xff] }
  0xe8   : > { %v929_v22 = vadd.f32 %v928_v20, %v1925_v17  ;;  %v664_v23 = vadd.f32 %v663_v21, %v1910_v9  ;;  %v752_v24 = vpop.f32.mrf.mxu1 }
  0xe9   : > { %1010 = vst [vmem:[%s1919_s26 + $0x10] sm:$0xff] %v840_v19  ;;  %v753_v25 = vadd.f32 %v752_v24, %v1912_v10 }
  0xea   : > { %1011 = vst [vmem:[%s1919_s26 + $0x18] sm:$0xff] %v929_v22 }
  0xeb   : > { %1012 = vst [vmem:[%s1919_s26 + $0x20] sm:$0xff] %v664_v23 }
  0xec   : > { %1013 = vst [vmem:[%s1919_s26 + $0x28] sm:$0xff] %v753_v25 }
  0xee   : > { %v841_v26 = vpop.f32.mrf.mxu2 }
  0xef   : > { %v842_v28 = vadd.f32 %v841_v26, %v1923_v16  ;;  %v930_v29 = vpop.f32.mrf.mxu3  ;;  %v666_v30 = vpop.f32.mrf.mxu0 }
  0xf0   : > { %v931_v31 = vadd.f32 %v930_v29, %v1925_v17  ;;  %v667_v32 = vadd.f32 %v666_v30, %v1910_v9  ;;  %v755_v33 = vpop.f32.mrf.mxu1 }
  0xf1   : > { %1014 = vst [vmem:[%s1919_s26 + $0x30] sm:$0xff] %v842_v28  ;;  %v756_v34 = vadd.f32 %v755_v33, %v1912_v10 }
  0xf2   : > { %1015 = vst [vmem:[%s1919_s26 + $0x38] sm:$0xff] %v931_v31  ;;  %705 = vmatmul.bf16.gmra.mxu0 %v1483_v27 }
  0xf3   : > { %1016 = vst [vmem:[%s1919_s26 + $0x40] sm:$0xff] %v667_v32  ;;  %794 = vmatmul.bf16.gmra.mxu1 %v1483_v27  ;;  %883 = vmatmul.bf16.gmra.mxu2 %v1483_v27 }
  0xf4   : > { %1017 = vst [vmem:[%s1919_s26 + $0x48] sm:$0xff] %v756_v34  ;;  %972 = vmatmul.bf16.gmra.mxu3 %v1483_v27 }
  0xf6   : > { %v844_v35 = vpop.f32.mrf.mxu2 }
  0xf7   : > { %v845_v36 = vadd.f32 %v844_v35, %v1923_v16  ;;  %v933_v37 = vpop.f32.mrf.mxu3  ;;  %v668_v38 = vpop.f32.mrf.mxu0  ;;  %v1487_v35 = vld [vmem:[%s2237_s0 + $0x68] sm:$0xff] }
  0xf8   : > { %v934_v39 = vadd.f32 %v933_v37, %v1925_v17  ;;  %v669_v40 = vadd.f32 %v668_v38, %v1910_v9  ;;  %v757_v41 = vpop.f32.mrf.mxu1 }
  0xf9   : > { %1018 = vst [vmem:[%s1919_s26 + $0x50] sm:$0xff] %v845_v36  ;;  %v758_v42 = vadd.f32 %v757_v41, %v1912_v10 }
  0xfa   : > { %1019 = vst [vmem:[%s1919_s26 + $0x58] sm:$0xff] %v934_v39 }
  0xfb   : > { %1020 = vst [vmem:[%s1919_s26 + $0x60] sm:$0xff] %v669_v40 }
  0xfc   : > { %1021 = vst [vmem:[%s1919_s26 + $0x68] sm:$0xff] %v758_v42 }
  0xfe   : > { %v846_v43 = vpop.f32.mrf.mxu2 }
  0xff   : > { %v847_v45 = vadd.f32 %v846_v43, %v1923_v16  ;;  %v935_v46 = vpop.f32.mrf.mxu3  ;;  %v671_v47 = vpop.f32.mrf.mxu0 }
 0x100   : > { %v936_v48 = vadd.f32 %v935_v46, %v1925_v17  ;;  %v672_v49 = vadd.f32 %v671_v47, %v1910_v9  ;;  %v760_v50 = vpop.f32.mrf.mxu1 }
 0x101   : > { %1022 = vst [vmem:[%s1919_s26 + $0x70] sm:$0xff] %v847_v45  ;;  %v761_v51 = vadd.f32 %v760_v50, %v1912_v10 }
 0x102   : > { %1023 = vst [vmem:[%s1919_s26 + $0x78] sm:$0xff] %v936_v48  ;;  %710 = vmatmul.bf16.gmra.mxu0 %v1484_v44 }
 0x103   : > { %1024 = vst [vmem:[%s1919_s26 + $0x80] sm:$0xff] %v672_v49  ;;  %799 = vmatmul.bf16.gmra.mxu1 %v1484_v44  ;;  %888 = vmatmul.bf16.gmra.mxu2 %v1484_v44 }
 0x104   : > { %1025 = vst [vmem:[%s1919_s26 + $0x88] sm:$0xff] %v761_v51  ;;  %977 = vmatmul.bf16.gmra.mxu3 %v1484_v44 }
 0x106   : > { %v849_v52 = vpop.f32.mrf.mxu2 }
 0x107   : > { %v850_v53 = vadd.f32 %v849_v52, %v1923_v16  ;;  %v938_v54 = vpop.f32.mrf.mxu3  ;;  %v673_v55 = vpop.f32.mrf.mxu0  ;;  %v1488_v52 = vld [vmem:[%s2237_s0 + $0x70] sm:$0xff] }
 0x108   : > { %v939_v56 = vadd.f32 %v938_v54, %v1925_v17  ;;  %v674_v57 = vadd.f32 %v673_v55, %v1910_v9  ;;  %v762_v58 = vpop.f32.mrf.mxu1 }
 0x109   : > { %1026 = vst [vmem:[%s1919_s26 + $0x90] sm:$0xff] %v850_v53  ;;  %v763_v59 = vadd.f32 %v762_v58, %v1912_v10 }
 0x10a   : > { %1027 = vst [vmem:[%s1919_s26 + $0x98] sm:$0xff] %v939_v56 }
 0x10b   : > { %1028 = vst [vmem:[%s1919_s26 + $0xa0] sm:$0xff] %v674_v57 }
 0x10c   : > { %1029 = vst [vmem:[%s1919_s26 + $0xa8] sm:$0xff] %v763_v59 }
 0x10e   : > { %v851_v60 = vpop.f32.mrf.mxu2 }
 0x10f   : > { %v852_v62 = vadd.f32 %v851_v60, %v1923_v16  ;;  %v940_v63 = vpop.f32.mrf.mxu3  ;;  %v676_v0 = vpop.f32.mrf.mxu0 }
 0x110   : > { %v941_v1 = vadd.f32 %v940_v63, %v1925_v17  ;;  %v677_v2 = vadd.f32 %v676_v0, %v1910_v9  ;;  %v765_v3 = vpop.f32.mrf.mxu1 }
 0x111   : > { %1030 = vst [vmem:[%s1919_s26 + $0xb0] sm:$0xff] %v852_v62  ;;  %v766_v4 = vadd.f32 %v765_v3, %v1912_v10 }
 0x112   : > { %1031 = vst [vmem:[%s1919_s26 + $0xb8] sm:$0xff] %v941_v1  ;;  %715 = vmatmul.bf16.gmra.mxu0 %v1485_v61 }
 0x113   : > { %1032 = vst [vmem:[%s1919_s26 + $0xc0] sm:$0xff] %v677_v2  ;;  %804 = vmatmul.bf16.gmra.mxu1 %v1485_v61  ;;  %893 = vmatmul.bf16.gmra.mxu2 %v1485_v61 }
 0x114   : > { %1033 = vst [vmem:[%s1919_s26 + $0xc8] sm:$0xff] %v766_v4  ;;  %982 = vmatmul.bf16.gmra.mxu3 %v1485_v61 }
 0x116   : > { %v854_v5 = vpop.f32.mrf.mxu2 }
 0x117   : > { %v855_v6 = vadd.f32 %v854_v5, %v1923_v16  ;;  %v943_v7 = vpop.f32.mrf.mxu3  ;;  %v678_v8 = vpop.f32.mrf.mxu0  ;;  %v1489_v5 = vld [vmem:[%s2237_s0 + $0x78] sm:$0xff] }
 0x118   : > { %v944_v11 = vadd.f32 %v943_v7, %v1925_v17  ;;  %v679_v12 = vadd.f32 %v678_v8, %v1910_v9  ;;  %v767_v13 = vpop.f32.mrf.mxu1 }
 0x119   : > { %1034 = vst [vmem:[%s1919_s26 + $0xd0] sm:$0xff] %v855_v6  ;;  %v768_v14 = vadd.f32 %v767_v13, %v1912_v10 }
 0x11a   : > { %1035 = vst [vmem:[%s1919_s26 + $0xd8] sm:$0xff] %v944_v11 }
 0x11b   : > { %1036 = vst [vmem:[%s1919_s26 + $0xe0] sm:$0xff] %v679_v12 }
 0x11c   : > { %1037 = vst [vmem:[%s1919_s26 + $0xe8] sm:$0xff] %v768_v14 }
 0x11e   : > { %v856_v15 = vpop.f32.mrf.mxu2 }
 0x11f   : > { %v857_v19 = vadd.f32 %v856_v15, %v1923_v16  ;;  %v945_v20 = vpop.f32.mrf.mxu3  ;;  %v681_v21 = vpop.f32.mrf.mxu0 }
 0x120   : > { %v946_v22 = vadd.f32 %v945_v20, %v1925_v17  ;;  %v682_v23 = vadd.f32 %v681_v21, %v1910_v9  ;;  %v770_v24 = vpop.f32.mrf.mxu1 }
 0x121   : > { %1038 = vst [vmem:[%s1919_s26 + $0xf0] sm:$0xff] %v857_v19  ;;  %v771_v25 = vadd.f32 %v770_v24, %v1912_v10 }
 0x122   : > { %1039 = vst [vmem:[%s1919_s26 + $0xf8] sm:$0xff] %v946_v22  ;;  %720 = vmatmul.bf16.gmra.mxu0 %v1486_v18 }
 0x123   : > { %1040 = vst [vmem:[%s1919_s26 + $0x100] sm:$0xff] %v682_v23  ;;  %809 = vmatmul.bf16.gmra.mxu1 %v1486_v18  ;;  %898 = vmatmul.bf16.gmra.mxu2 %v1486_v18 }
 0x124   : > { %1041 = vst [vmem:[%s1919_s26 + $0x108] sm:$0xff] %v771_v25  ;;  %987 = vmatmul.bf16.gmra.mxu3 %v1486_v18 }
 0x126   : > { %v859_v26 = vpop.f32.mrf.mxu2 }
 0x127   : > { %v860_v27 = vadd.f32 %v859_v26, %v1923_v16  ;;  %v948_v28 = vpop.f32.mrf.mxu3  ;;  %v683_v29 = vpop.f32.mrf.mxu0 }
 0x128   : > { %v949_v30 = vadd.f32 %v948_v28, %v1925_v17  ;;  %v684_v31 = vadd.f32 %v683_v29, %v1910_v9  ;;  %v772_v32 = vpop.f32.mrf.mxu1 }
 0x129   : > { %1042 = vst [vmem:[%s1919_s26 + $0x110] sm:$0xff] %v860_v27  ;;  %v773_v33 = vadd.f32 %v772_v32, %v1912_v10 }
 0x12a   : > { %1043 = vst [vmem:[%s1919_s26 + $0x118] sm:$0xff] %v949_v30 }
 0x12b   : > { %1044 = vst [vmem:[%s1919_s26 + $0x120] sm:$0xff] %v684_v31 }
 0x12c   : > { %1045 = vst [vmem:[%s1919_s26 + $0x128] sm:$0xff] %v773_v33 }
 0x12e   : > { %v861_v34 = vpop.f32.mrf.mxu2 }
 0x12f   : > { %v862_v36 = vadd.f32 %v861_v34, %v1923_v16  ;;  %v950_v37 = vpop.f32.mrf.mxu3  ;;  %v686_v38 = vpop.f32.mrf.mxu0 }
 0x130   : > { %v951_v39 = vadd.f32 %v950_v37, %v1925_v17  ;;  %v687_v40 = vadd.f32 %v686_v38, %v1910_v9  ;;  %v775_v41 = vpop.f32.mrf.mxu1 }
 0x131   : > { %1046 = vst [vmem:[%s1919_s26 + $0x130] sm:$0xff] %v862_v36  ;;  %v776_v42 = vadd.f32 %v775_v41, %v1912_v10 }
 0x132   : > { %1047 = vst [vmem:[%s1919_s26 + $0x138] sm:$0xff] %v951_v39  ;;  %725 = vmatmul.bf16.gmra.mxu0 %v1487_v35 }
 0x133   : > { %1048 = vst [vmem:[%s1919_s26 + $0x140] sm:$0xff] %v687_v40  ;;  %814 = vmatmul.bf16.gmra.mxu1 %v1487_v35  ;;  %903 = vmatmul.bf16.gmra.mxu2 %v1487_v35 }
 0x134   : > { %1049 = vst [vmem:[%s1919_s26 + $0x148] sm:$0xff] %v776_v42  ;;  %992 = vmatmul.bf16.gmra.mxu3 %v1487_v35 }
 0x136   : > { %v864_v43 = vpop.f32.mrf.mxu2 }
 0x137   : > { %v865_v44 = vadd.f32 %v864_v43, %v1923_v16  ;;  %v953_v45 = vpop.f32.mrf.mxu3  ;;  %v688_v46 = vpop.f32.mrf.mxu0 }
 0x138   : > { %v954_v47 = vadd.f32 %v953_v45, %v1925_v17  ;;  %v689_v48 = vadd.f32 %v688_v46, %v1910_v9  ;;  %v777_v49 = vpop.f32.mrf.mxu1 }
 0x139   : > { %1050 = vst [vmem:[%s1919_s26 + $0x150] sm:$0xff] %v865_v44  ;;  %v778_v50 = vadd.f32 %v777_v49, %v1912_v10 }
 0x13a   : > { %1051 = vst [vmem:[%s1919_s26 + $0x158] sm:$0xff] %v954_v47 }
 0x13b   : > { %1052 = vst [vmem:[%s1919_s26 + $0x160] sm:$0xff] %v689_v48 }
 0x13c   : > { %1053 = vst [vmem:[%s1919_s26 + $0x168] sm:$0xff] %v778_v50 }
 0x13e   : > { %v866_v51 = vpop.f32.mrf.mxu2 }
 0x13f   : > { %v867_v53 = vadd.f32 %v866_v51, %v1923_v16  ;;  %v955_v54 = vpop.f32.mrf.mxu3  ;;  %v691_v55 = vpop.f32.mrf.mxu0 }
 0x140   : > { %v956_v56 = vadd.f32 %v955_v54, %v1925_v17  ;;  %v692_v57 = vadd.f32 %v691_v55, %v1910_v9  ;;  %v780_v58 = vpop.f32.mrf.mxu1 }
 0x141   : > { %1054 = vst [vmem:[%s1919_s26 + $0x170] sm:$0xff] %v867_v53  ;;  %v781_v59 = vadd.f32 %v780_v58, %v1912_v10 }
 0x142   : > { %1055 = vst [vmem:[%s1919_s26 + $0x178] sm:$0xff] %v956_v56  ;;  %730 = vmatmul.bf16.gmra.mxu0 %v1488_v52 }
 0x143   : > { %1056 = vst [vmem:[%s1919_s26 + $0x180] sm:$0xff] %v692_v57  ;;  %819 = vmatmul.bf16.gmra.mxu1 %v1488_v52  ;;  %908 = vmatmul.bf16.gmra.mxu2 %v1488_v52 }
 0x144   : > { %1057 = vst [vmem:[%s1919_s26 + $0x188] sm:$0xff] %v781_v59  ;;  %997 = vmatmul.bf16.gmra.mxu3 %v1488_v52 }
 0x146   : > { %v869_v60 = vpop.f32.mrf.mxu2 }
 0x147   : > { %v870_v61 = vadd.f32 %v869_v60, %v1923_v16  ;;  %v958_v62 = vpop.f32.mrf.mxu3  ;;  %v693_v63 = vpop.f32.mrf.mxu0 }
 0x148   : > { %v959_v0 = vadd.f32 %v958_v62, %v1925_v17  ;;  %v694_v1 = vadd.f32 %v693_v63, %v1910_v9  ;;  %v782_v2 = vpop.f32.mrf.mxu1 }
 0x149   : > { %1058 = vst [vmem:[%s1919_s26 + $0x190] sm:$0xff] %v870_v61  ;;  %v783_v3 = vadd.f32 %v782_v2, %v1912_v10 }
 0x14a   : > { %1059 = vst [vmem:[%s1919_s26 + $0x198] sm:$0xff] %v959_v0 }
 0x14b   : > { %1060 = vst [vmem:[%s1919_s26 + $0x1a0] sm:$0xff] %v694_v1 }
 0x14c   : > { %1061 = vst [vmem:[%s1919_s26 + $0x1a8] sm:$0xff] %v783_v3 }
 0x14e   : > { %v871_v4 = vpop.f32.mrf.mxu2 }
 0x14f   : > { %v872_v6 = vadd.f32 %v871_v4, %v1923_v16  ;;  %v960_v7 = vpop.f32.mrf.mxu3  ;;  %v696_v8 = vpop.f32.mrf.mxu0 }
 0x150   : > { %v961_v11 = vadd.f32 %v960_v7, %v1925_v17  ;;  %v697_v12 = vadd.f32 %v696_v8, %v1910_v9  ;;  %v785_v13 = vpop.f32.mrf.mxu1 }
 0x151   : > { %1062 = vst [vmem:[%s1919_s26 + $0x1b0] sm:$0xff] %v872_v6  ;;  %v786_v14 = vadd.f32 %v785_v13, %v1912_v10 }
 0x152   : > { %1063 = vst [vmem:[%s1919_s26 + $0x1b8] sm:$0xff] %v961_v11  ;;  %735 = vmatmul.bf16.gmra.mxu0 %v1489_v5 }
 0x153   : > { %1064 = vst [vmem:[%s1919_s26 + $0x1c0] sm:$0xff] %v697_v12  ;;  %824 = vmatmul.bf16.gmra.mxu1 %v1489_v5  ;;  %913 = vmatmul.bf16.gmra.mxu2 %v1489_v5 }
 0x154   : > { %1065 = vst [vmem:[%s1919_s26 + $0x1c8] sm:$0xff] %v786_v14  ;;  %1002 = vmatmul.bf16.gmra.mxu3 %v1489_v5 }
 0x156   : > { %v874_v15 = vpop.f32.mrf.mxu2 }
 0x157   : > { %v875_v18 = vadd.f32 %v874_v15, %v1923_v16  ;;  %v963_v19 = vpop.f32.mrf.mxu3  ;;  %v698_v20 = vpop.f32.mrf.mxu0 }
 0x158   : > { %v964_v21 = vadd.f32 %v963_v19, %v1925_v17  ;;  %v699_v22 = vadd.f32 %v698_v20, %v1910_v9  ;;  %v787_v23 = vpop.f32.mrf.mxu1 }
 0x159   : > { %1066 = vst [vmem:[%s1919_s26 + $0x1d0] sm:$0xff] %v875_v18  ;;  %v788_v24 = vadd.f32 %v787_v23, %v1912_v10 }
 0x15a   : > { %1067 = vst [vmem:[%s1919_s26 + $0x1d8] sm:$0xff] %v964_v21 }
 0x15b   : > { %1068 = vst [vmem:[%s1919_s26 + $0x1e0] sm:$0xff] %v699_v22 }
 0x15c   : > { %1069 = vst [vmem:[%s1919_s26 + $0x1e8] sm:$0xff] %v788_v24 }
 0x15e   : > { %v876_v25 = vpop.f32.mrf.mxu2 }
 0x15f   : > { %v877_v26 = vadd.f32 %v876_v25, %v1923_v16  ;;  %v965_v27 = vpop.f32.mrf.mxu3  ;;  %v701_v28 = vpop.f32.mrf.mxu0 }
 0x160   : > { %v966_v29 = vadd.f32 %v965_v27, %v1925_v17  ;;  %v702_v30 = vadd.f32 %v701_v28, %v1910_v9  ;;  %v790_v31 = vpop.f32.mrf.mxu1 }
 0x161   : > { %1070 = vst [vmem:[%s1919_s26 + $0x1f0] sm:$0xff] %v877_v26  ;;  %v791_v32 = vadd.f32 %v790_v31, %v1912_v10 }
 0x162   : > { %1071 = vst [vmem:[%s1919_s26 + $0x1f8] sm:$0xff] %v966_v29 }
 0x163   : > { %1072 = vst [vmem:[%s1919_s26 + $0x200] sm:$0xff] %v702_v30 }
 0x164   : > { %1073 = vst [vmem:[%s1919_s26 + $0x208] sm:$0xff] %v791_v32 }
 0x166   : > { %v879_v33 = vpop.f32.mrf.mxu2 }
 0x167   : > { %v880_v34 = vadd.f32 %v879_v33, %v1923_v16  ;;  %v968_v35 = vpop.f32.mrf.mxu3  ;;  %v703_v36 = vpop.f32.mrf.mxu0 }
 0x168   : > { %v969_v37 = vadd.f32 %v968_v35, %v1925_v17  ;;  %v704_v38 = vadd.f32 %v703_v36, %v1910_v9  ;;  %v792_v39 = vpop.f32.mrf.mxu1 }
 0x169   : > { %1074 = vst [vmem:[%s1919_s26 + $0x210] sm:$0xff] %v880_v34  ;;  %v793_v40 = vadd.f32 %v792_v39, %v1912_v10 }
 0x16a   : > { %1075 = vst [vmem:[%s1919_s26 + $0x218] sm:$0xff] %v969_v37 }
 0x16b   : > { %1076 = vst [vmem:[%s1919_s26 + $0x220] sm:$0xff] %v704_v38 }
 0x16c   : > { %1077 = vst [vmem:[%s1919_s26 + $0x228] sm:$0xff] %v793_v40 }
 0x16e   : > { %v881_v41 = vpop.f32.mrf.mxu2 }
 0x16f   : > { %v882_v42 = vadd.f32 %v881_v41, %v1923_v16  ;;  %v970_v43 = vpop.f32.mrf.mxu3  ;;  %v706_v44 = vpop.f32.mrf.mxu0 }
 0x170   : > { %v971_v45 = vadd.f32 %v970_v43, %v1925_v17  ;;  %v707_v46 = vadd.f32 %v706_v44, %v1910_v9  ;;  %v795_v47 = vpop.f32.mrf.mxu1 }
 0x171   : > { %1078 = vst [vmem:[%s1919_s26 + $0x230] sm:$0xff] %v882_v42  ;;  %v796_v48 = vadd.f32 %v795_v47, %v1912_v10 }
 0x172   : > { %1079 = vst [vmem:[%s1919_s26 + $0x238] sm:$0xff] %v971_v45 }
 0x173   : > { %1080 = vst [vmem:[%s1919_s26 + $0x240] sm:$0xff] %v707_v46 }
 0x174   : > { %1081 = vst [vmem:[%s1919_s26 + $0x248] sm:$0xff] %v796_v48 }
 0x176   : > { %v884_v49 = vpop.f32.mrf.mxu2 }
 0x177   : > { %v885_v50 = vadd.f32 %v884_v49, %v1923_v16  ;;  %v973_v51 = vpop.f32.mrf.mxu3  ;;  %v708_v52 = vpop.f32.mrf.mxu0 }
 0x178   : > { %v974_v53 = vadd.f32 %v973_v51, %v1925_v17  ;;  %v709_v54 = vadd.f32 %v708_v52, %v1910_v9  ;;  %v797_v55 = vpop.f32.mrf.mxu1 }
 0x179   : > { %1082 = vst [vmem:[%s1919_s26 + $0x250] sm:$0xff] %v885_v50  ;;  %v798_v56 = vadd.f32 %v797_v55, %v1912_v10 }
 0x17a   : > { %1083 = vst [vmem:[%s1919_s26 + $0x258] sm:$0xff] %v974_v53 }
 0x17b   : > { %1084 = vst [vmem:[%s1919_s26 + $0x260] sm:$0xff] %v709_v54 }
 0x17c   : > { %1085 = vst [vmem:[%s1919_s26 + $0x268] sm:$0xff] %v798_v56 }
 0x17e   : > { %v886_v57 = vpop.f32.mrf.mxu2 }
 0x17f   : > { %v887_v58 = vadd.f32 %v886_v57, %v1923_v16  ;;  %v975_v59 = vpop.f32.mrf.mxu3  ;;  %v711_v60 = vpop.f32.mrf.mxu0 }
 0x180   : > { %v976_v61 = vadd.f32 %v975_v59, %v1925_v17  ;;  %v712_v62 = vadd.f32 %v711_v60, %v1910_v9  ;;  %v800_v63 = vpop.f32.mrf.mxu1 }
 0x181   : > { %1086 = vst [vmem:[%s1919_s26 + $0x270] sm:$0xff] %v887_v58  ;;  %v801_v0 = vadd.f32 %v800_v63, %v1912_v10 }
 0x182   : > { %1087 = vst [vmem:[%s1919_s26 + $0x278] sm:$0xff] %v976_v61 }
 0x183   : > { %1088 = vst [vmem:[%s1919_s26 + $0x280] sm:$0xff] %v712_v62 }
 0x184   : > { %1089 = vst [vmem:[%s1919_s26 + $0x288] sm:$0xff] %v801_v0 }
 0x186   : > { %v889_v1 = vpop.f32.mrf.mxu2 }
 0x187   : > { %v890_v2 = vadd.f32 %v889_v1, %v1923_v16  ;;  %v978_v3 = vpop.f32.mrf.mxu3  ;;  %v713_v4 = vpop.f32.mrf.mxu0 }
 0x188   : > { %v979_v5 = vadd.f32 %v978_v3, %v1925_v17  ;;  %v714_v6 = vadd.f32 %v713_v4, %v1910_v9  ;;  %v802_v7 = vpop.f32.mrf.mxu1 }
 0x189   : > { %1090 = vst [vmem:[%s1919_s26 + $0x290] sm:$0xff] %v890_v2  ;;  %v803_v8 = vadd.f32 %v802_v7, %v1912_v10 }
 0x18a   : > { %1091 = vst [vmem:[%s1919_s26 + $0x298] sm:$0xff] %v979_v5 }
 0x18b   : > { %1092 = vst [vmem:[%s1919_s26 + $0x2a0] sm:$0xff] %v714_v6 }
 0x18c   : > { %1093 = vst [vmem:[%s1919_s26 + $0x2a8] sm:$0xff] %v803_v8 }
 0x18e   : > { %v891_v11 = vpop.f32.mrf.mxu2 }
 0x18f   : > { %v892_v12 = vadd.f32 %v891_v11, %v1923_v16  ;;  %v980_v13 = vpop.f32.mrf.mxu3  ;;  %v716_v14 = vpop.f32.mrf.mxu0 }
 0x190   : > { %v981_v15 = vadd.f32 %v980_v13, %v1925_v17  ;;  %v717_v18 = vadd.f32 %v716_v14, %v1910_v9  ;;  %v805_v19 = vpop.f32.mrf.mxu1 }
 0x191   : > { %1094 = vst [vmem:[%s1919_s26 + $0x2b0] sm:$0xff] %v892_v12  ;;  %v806_v20 = vadd.f32 %v805_v19, %v1912_v10 }
 0x192   : > { %1095 = vst [vmem:[%s1919_s26 + $0x2b8] sm:$0xff] %v981_v15 }
 0x193   : > { %1096 = vst [vmem:[%s1919_s26 + $0x2c0] sm:$0xff] %v717_v18 }
 0x194   : > { %1097 = vst [vmem:[%s1919_s26 + $0x2c8] sm:$0xff] %v806_v20 }
 0x196   : > { %v894_v21 = vpop.f32.mrf.mxu2 }
 0x197   : > { %v895_v22 = vadd.f32 %v894_v21, %v1923_v16  ;;  %v983_v23 = vpop.f32.mrf.mxu3  ;;  %v718_v24 = vpop.f32.mrf.mxu0 }
 0x198   : > { %v984_v25 = vadd.f32 %v983_v23, %v1925_v17  ;;  %v719_v26 = vadd.f32 %v718_v24, %v1910_v9  ;;  %v807_v27 = vpop.f32.mrf.mxu1 }
 0x199   : > { %1098 = vst [vmem:[%s1919_s26 + $0x2d0] sm:$0xff] %v895_v22  ;;  %v808_v28 = vadd.f32 %v807_v27, %v1912_v10 }
 0x19a   : > { %1099 = vst [vmem:[%s1919_s26 + $0x2d8] sm:$0xff] %v984_v25 }
 0x19b   : > { %1100 = vst [vmem:[%s1919_s26 + $0x2e0] sm:$0xff] %v719_v26 }
 0x19c   : > { %1101 = vst [vmem:[%s1919_s26 + $0x2e8] sm:$0xff] %v808_v28 }
 0x19e   : > { %v896_v29 = vpop.f32.mrf.mxu2 }
 0x19f   : > { %v897_v30 = vadd.f32 %v896_v29, %v1923_v16  ;;  %v985_v31 = vpop.f32.mrf.mxu3  ;;  %v721_v32 = vpop.f32.mrf.mxu0 }
 0x1a0   : > { %v986_v33 = vadd.f32 %v985_v31, %v1925_v17  ;;  %v722_v34 = vadd.f32 %v721_v32, %v1910_v9  ;;  %v810_v35 = vpop.f32.mrf.mxu1 }
 0x1a1   : > { %1102 = vst [vmem:[%s1919_s26 + $0x2f0] sm:$0xff] %v897_v30  ;;  %v811_v36 = vadd.f32 %v810_v35, %v1912_v10 }
 0x1a2   : > { %1103 = vst [vmem:[%s1919_s26 + $0x2f8] sm:$0xff] %v986_v33 }
 0x1a3   : > { %1104 = vst [vmem:[%s1919_s26 + $0x300] sm:$0xff] %v722_v34 }
 0x1a4   : > { %1105 = vst [vmem:[%s1919_s26 + $0x308] sm:$0xff] %v811_v36 }
 0x1a6   : > { %v899_v37 = vpop.f32.mrf.mxu2 }
 0x1a7   : > { %v900_v38 = vadd.f32 %v899_v37, %v1923_v16  ;;  %v988_v39 = vpop.f32.mrf.mxu3  ;;  %v723_v40 = vpop.f32.mrf.mxu0 }
 0x1a8   : > { %v989_v41 = vadd.f32 %v988_v39, %v1925_v17  ;;  %v724_v42 = vadd.f32 %v723_v40, %v1910_v9  ;;  %v812_v43 = vpop.f32.mrf.mxu1 }
 0x1a9   : > { %1106 = vst [vmem:[%s1919_s26 + $0x310] sm:$0xff] %v900_v38  ;;  %v813_v44 = vadd.f32 %v812_v43, %v1912_v10 }
 0x1aa   : > { %1107 = vst [vmem:[%s1919_s26 + $0x318] sm:$0xff] %v989_v41 }
 0x1ab   : > { %1108 = vst [vmem:[%s1919_s26 + $0x320] sm:$0xff] %v724_v42 }
 0x1ac   : > { %1109 = vst [vmem:[%s1919_s26 + $0x328] sm:$0xff] %v813_v44 }
 0x1ae   : > { %v901_v45 = vpop.f32.mrf.mxu2 }
 0x1af   : > { %v902_v46 = vadd.f32 %v901_v45, %v1923_v16  ;;  %v990_v47 = vpop.f32.mrf.mxu3  ;;  %v726_v48 = vpop.f32.mrf.mxu0 }
 0x1b0   : > { %v991_v49 = vadd.f32 %v990_v47, %v1925_v17  ;;  %v727_v50 = vadd.f32 %v726_v48, %v1910_v9  ;;  %v815_v51 = vpop.f32.mrf.mxu1 }
 0x1b1   : > { %1110 = vst [vmem:[%s1919_s26 + $0x330] sm:$0xff] %v902_v46  ;;  %v816_v52 = vadd.f32 %v815_v51, %v1912_v10 }
 0x1b2   : > { %1111 = vst [vmem:[%s1919_s26 + $0x338] sm:$0xff] %v991_v49 }
 0x1b3   : > { %1112 = vst [vmem:[%s1919_s26 + $0x340] sm:$0xff] %v727_v50 }
 0x1b4   : > { %1113 = vst [vmem:[%s1919_s26 + $0x348] sm:$0xff] %v816_v52 }
 0x1b6   : > { %v904_v53 = vpop.f32.mrf.mxu2 }
 0x1b7   : > { %v905_v54 = vadd.f32 %v904_v53, %v1923_v16  ;;  %v993_v55 = vpop.f32.mrf.mxu3  ;;  %v728_v56 = vpop.f32.mrf.mxu0 }
 0x1b8   : > { %v994_v57 = vadd.f32 %v993_v55, %v1925_v17  ;;  %v729_v58 = vadd.f32 %v728_v56, %v1910_v9  ;;  %v817_v59 = vpop.f32.mrf.mxu1 }
 0x1b9   : > { %1114 = vst [vmem:[%s1919_s26 + $0x350] sm:$0xff] %v905_v54  ;;  %v818_v60 = vadd.f32 %v817_v59, %v1912_v10 }
 0x1ba   : > { %1115 = vst [vmem:[%s1919_s26 + $0x358] sm:$0xff] %v994_v57 }
 0x1bb   : > { %1116 = vst [vmem:[%s1919_s26 + $0x360] sm:$0xff] %v729_v58 }
 0x1bc   : > { %1117 = vst [vmem:[%s1919_s26 + $0x368] sm:$0xff] %v818_v60 }
 0x1be   : > { %v906_v61 = vpop.f32.mrf.mxu2 }
 0x1bf   : > { %v907_v62 = vadd.f32 %v906_v61, %v1923_v16  ;;  %v995_v63 = vpop.f32.mrf.mxu3  ;;  %v731_v0 = vpop.f32.mrf.mxu0 }
 0x1c0   : > { %v996_v1 = vadd.f32 %v995_v63, %v1925_v17  ;;  %v732_v2 = vadd.f32 %v731_v0, %v1910_v9  ;;  %v820_v3 = vpop.f32.mrf.mxu1 }
 0x1c1   : > { %1118 = vst [vmem:[%s1919_s26 + $0x370] sm:$0xff] %v907_v62  ;;  %v821_v4 = vadd.f32 %v820_v3, %v1912_v10 }
 0x1c2   : > { %1119 = vst [vmem:[%s1919_s26 + $0x378] sm:$0xff] %v996_v1 }
 0x1c3   : > { %1120 = vst [vmem:[%s1919_s26 + $0x380] sm:$0xff] %v732_v2 }
 0x1c4   : > { %1121 = vst [vmem:[%s1919_s26 + $0x388] sm:$0xff] %v821_v4 }
 0x1c6   : > { %v909_v5 = vpop.f32.mrf.mxu2 }
 0x1c7   : > { %v910_v6 = vadd.f32 %v909_v5, %v1923_v16  ;;  %v998_v7 = vpop.f32.mrf.mxu3  ;;  %v733_v8 = vpop.f32.mrf.mxu0 }
 0x1c8   : > { %v999_v11 = vadd.f32 %v998_v7, %v1925_v17  ;;  %v734_v12 = vadd.f32 %v733_v8, %v1910_v9  ;;  %v822_v13 = vpop.f32.mrf.mxu1 }
 0x1c9   : > { %1122 = vst [vmem:[%s1919_s26 + $0x390] sm:$0xff] %v910_v6  ;;  %v823_v14 = vadd.f32 %v822_v13, %v1912_v10 }
 0x1ca   : > { %1123 = vst [vmem:[%s1919_s26 + $0x398] sm:$0xff] %v999_v11 }
 0x1cb   : > { %1124 = vst [vmem:[%s1919_s26 + $0x3a0] sm:$0xff] %v734_v12 }
 0x1cc   : > { %1125 = vst [vmem:[%s1919_s26 + $0x3a8] sm:$0xff] %v823_v14 }
 0x1ce   : > { %v911_v15 = vpop.f32.mrf.mxu2 }
 0x1cf   : > { %v912_v18 = vadd.f32 %v911_v15, %v1923_v16  ;;  %v1000_v19 = vpop.f32.mrf.mxu3  ;;  %v736_v20 = vpop.f32.mrf.mxu0 }
 0x1d0   : > { %v1001_v21 = vadd.f32 %v1000_v19, %v1925_v17  ;;  %v737_v22 = vadd.f32 %v736_v20, %v1910_v9  ;;  %v825_v23 = vpop.f32.mrf.mxu1 }
 0x1d1   : > { %1126 = vst [vmem:[%s1919_s26 + $0x3b0] sm:$0xff] %v912_v18  ;;  %v826_v24 = vadd.f32 %v825_v23, %v1912_v10 }
 0x1d2   : > { %1127 = vst [vmem:[%s1919_s26 + $0x3b8] sm:$0xff] %v1001_v21 }
 0x1d3   : > { %1128 = vst [vmem:[%s1919_s26 + $0x3c0] sm:$0xff] %v737_v22 }
 0x1d4   : > { %1129 = vst [vmem:[%s1919_s26 + $0x3c8] sm:$0xff] %v826_v24 }
 0x1d6   : > { %v914_v25 = vpop.f32.mrf.mxu2 }
 0x1d7   : > { %v915_v26 = vadd.f32 %v914_v25, %v1923_v16  ;;  %v1003_v27 = vpop.f32.mrf.mxu3  ;;  %v738_v28 = vpop.f32.mrf.mxu0 }
 0x1d8   : > { %v1004_v29 = vadd.f32 %v1003_v27, %v1925_v17  ;;  %v739_v30 = vadd.f32 %v738_v28, %v1910_v9  ;;  %v827_v31 = vpop.f32.mrf.mxu1 }
 0x1d9   : > { %1130 = vst [vmem:[%s1919_s26 + $0x3d0] sm:$0xff] %v915_v26  ;;  %v828_v32 = vadd.f32 %v827_v31, %v1912_v10 }
 0x1da   : > { %1131 = vst [vmem:[%s1919_s26 + $0x3d8] sm:$0xff] %v1004_v29 }
 0x1db   : > { %1132 = vst [vmem:[%s1919_s26 + $0x3e0] sm:$0xff] %v739_v30 }
 0x1dc   : > { %1133 = vst [vmem:[%s1919_s26 + $0x3e8] sm:$0xff] %v828_v32 }
 0x1de   : > { %v916_v33 = vpop.f32.mrf.mxu2  ;;  %1143 = sbr.rel (!%p1718_p5) target bundleno = 498 (0x1f2), region = 59 }
 0x1df   : > { %v917_v34 = vadd.f32 %v916_v33, %v1923_v16  ;;  %v1005_v35 = vpop.f32.mrf.mxu3 }
 0x1e0   : > { %v1006_v36 = vadd.f32 %v1005_v35, %v1925_v17 }
 0x1e1   : > { %1134 = vst [vmem:[%s1919_s26 + $0x3f0] sm:$0xff] %v917_v34 }
 0x1e2   : > { %1135 = vst [vmem:[%s1919_s26 + $0x3f8] sm:$0xff] %v1006_v36 }
 0x1e3   : > { %1151 = vsyncadd %s1137_s23, 14848  ;;  %s1522_s27 = sshll.u32 %s1646_s15, 5  ;;  %s1158_s28 = sshll.u32 %s1919_s26, 4  ;;  %s1159_s28 = int_to_ptr.vmem [resolvable:$true] %s1158_s28 }
 0x1e4   : > { %s1156_s4 = scalar_lea.hbm %s2240_s3, %s1522_s27  ;;  %s1596_s22 = scalar_lea.hbm %s2240_s3, 192 }
 0x1e5   : > { %s1160_s5 = sshll.u32 %s1156_s4, 4  ;;  %s1161_s5 = int_to_ptr.hbm [resolvable:$true] %s1160_s5 }
 0x1e6   : > { %s1592_s7 = sshra.s32 %s1161_s5, 4  ;;  %s1593_s7 = int_to_ptr.hbm [resolvable:$true] %s1592_s7 }
 0x1e7   : > { %s1594_s8 = scalar_lea.hbm %s1593_s7, 96  ;;  %p1597_p2 = scmp.lt.s32.totalorder %s1593_s7, %s2240_s3 }
 0x1e8   : > { %p1595_p1 = scmp.ne.s32.totalorder %s1593_s7, %s1594_s8  ;;  %p1598_p3 = scmp.lt.s32.totalorder %s1596_s22, %s1594_s8 }
 0x1ea   : > { %p1599_p4 = por %p1598_p3, %p1597_p2 }
 0x1ec   : > { %p1600_p5 = pnand %p1599_p4, %p1595_p1 }
 0x1ee   : > { %1603 = shalt.err (!%p1600_p5)
}
 0x1ef   : > { %s1656_s15 = smov 512   ;;  %s1657_s26 = smov 1024  }
 0x1f0   : > { %s1658_s18 = smov 32  }
 0x1f1   : > { %1166 = dma.vmem_to_hbm [thread:$0]  %s1159_s28, 1536, %s1161_s5, %s1137_s23, %s1656_s15, %s1657_s26, %s1658_s18  }
 0x1f2 PF: > { %s1175_s19 = sand.u32 1, %s1634_s12   ;;  %p1525_p6 = pnand %p1268_p10, %p1729_p9 }
 0x1f3   : > { %s1176_s21 = scalar_lea.sflag [#allocation4], %s1175_s19 }
 0x1f4   : > { %p1526_p7 = pneg %p1525_p6 }
 0x1f6   : > { %1629 = dma.done.wait (%p1526_p7), %s1176_s21, 16384  }
 0x1f7   : > { %1631 = vsyncadd (%p1526_p7), %s1176_s21, 4294950912  ;;  %s16_s17 = sadd.s32 1, %s1654_s17   ;;  %s2243_s12 = smov %s1638_s13 }
 0x1f8   : > { %p13_p8 = scmp.ge.s32.totalorder %s16_s17, 4   ;;  %s2244_s13 = smov %s1642_s14 }
 0x1f9   : > { %s2245_s14 = smov %s1727_s24  ;;  %s2246_s15 = smov %s1650_s16 }
 0x1fa   : > { %s2247_s16 = smov %s2249_s20  ;;  %15 = sbr.rel (!%p13_p8) target bundleno = 4 (0x4), region = 101 }
 0x1ff   :  { %1182 = vsyncpa [#allocation4], 1 }
 0x200   :  { %1184 = vsyncpa [#allocation4 + $0x1], 1 }

</bundles_post_ra>
